<compile_context>
chip_gen: v7x
topology: tpu7x:2x2x1
jax: 0.10.0
libtpu: 0.0.40
codegen_flags: <defaults>
</compile_context>

<pallas_src>
import jax
import jax.numpy as jnp
from jax.experimental import pallas as pl
from jax.experimental.pallas import tpu as pltpu


# ---------------------------------------------------------------------------
# Hardware-aware VMEM sizing
# ---------------------------------------------------------------------------
def _vmem_capacity_bytes() -> int:
    """Per-TensorCore VMEM capacity; conservative fallback if the query fails."""
    try:
        info = pltpu.get_tpu_info()
        cap = getattr(info, "vmem_capacity_bytes", None)
        if cap:
            return int(cap)
    except Exception:
        pass
    return 64 << 20  # v7x-sized fallback: never over-commit


def _sublane_tile(itemsize: int) -> int:
    # 8 sublanes per 32-bit vreg row; sub-32-bit dtypes pack along sublanes.
    return max(8, 32 // max(int(itemsize), 1))


def _choose_seq_tile(seq_len, heads, dim, qk_itemsize, budget_bytes):
    """Largest seq tile whose pipelined working set fits the VMEM budget."""
    st = _sublane_tile(qk_itemsize)
    hp = ((heads + st - 1) // st) * st          # sublane-padded heads
    row_qk = hp * dim * qk_itemsize             # one seq row of one q/k block
    row_tab = dim * 4                           # one row of cos or sin (f32)
    # q, k, q_out, k_out + cos, sin blocks, each double-buffered by the pipeline.
    pipelined = 2 * (4 * row_qk + 2 * row_tab)
    # In-kernel block-granularity temporaries: f32 upcasts of q/k + rolled copies.
    temps = 4 * hp * dim * 4
    per_row = pipelined + temps
    ts = max(8, int(budget_bytes) // max(per_row, 1))
    ts = min(ts, seq_len)
    if ts >= seq_len:
        return seq_len                           # full seq fits: single seq block
    return max(8, (ts // 8) * 8)                 # keep cos/sin sublane dim aligned


# ---------------------------------------------------------------------------
# Kernel 1: build cos/sin tables  (forward() of the module)
# ---------------------------------------------------------------------------
def _rope_tables_kernel(inv_freq_ref, cos_ref, sin_ref):
    # cos_ref / sin_ref: [TS, D] tile; inv_freq_ref: [1, D//2]
    TS, D = cos_ref.shape
    half = D // 2
    base_row = pl.program_id(0) * TS
    row = jax.lax.broadcasted_iota(jnp.int32, (TS, half), 0) + base_row
    freqs = row.astype(jnp.float32) * inv_freq_ref[...]      # einsum('i,j->ij') tile
    c = jnp.cos(freqs)                                        # [TS, half] only:
    s = jnp.sin(freqs)                                        # half the EUP work
    # emb = cat((freqs, freqs), -1); single full-width (unmasked, lane-dense) stores.
    cos_ref[...] = jnp.concatenate([c, c], axis=-1)
    sin_ref[...] = jnp.concatenate([s, s], axis=-1)


def rope_tables(inv_freq, seq_len, dim):
    half = dim // 2
    inv_freq_2d = jnp.asarray(inv_freq, dtype=jnp.float32).reshape(1, half)
    # Tile over seq so long contexts (8k-32k) don't blow scoped VMEM.
    ts = seq_len if seq_len <= 512 else 512
    grid = (pl.cdiv(seq_len, ts),)
    cos, sin = pl.pallas_call(
        _rope_tables_kernel,
        out_shape=(
            jax.ShapeDtypeStruct((seq_len, dim), jnp.float32),
            jax.ShapeDtypeStruct((seq_len, dim), jnp.float32),
        ),
        grid=grid,
        in_specs=[pl.BlockSpec((1, half), lambda i: (0, 0))],
        out_specs=(
            pl.BlockSpec((ts, dim), lambda i: (i, 0)),
            pl.BlockSpec((ts, dim), lambda i: (i, 0)),
        ),
        compiler_params=pltpu.CompilerParams(dimension_semantics=("parallel",)),
    )(inv_freq_2d)
    return cos, sin


# ---------------------------------------------------------------------------
# Kernel 2: apply rotary embedding to q and k  (apply_rotary_pos_emb)
# ---------------------------------------------------------------------------
def _apply_rope_kernel(cos_ref, sin_ref, q_ref, k_ref, qo_ref, ko_ref):
    # cos_ref/sin_ref: [TS, D] f32 (sin already sign-folded in the wrapper)
    # q_ref/k_ref/qo_ref/ko_ref: [1, TS, H, D]
    D = cos_ref.shape[-1]
    half = D // 2

    # Hoisted broadcasts (computed once per grid step).
    cos_b = cos_ref[...][None, :, None, :]       # [1, TS, 1, D]
    sin_b = sin_ref[...][None, :, None, :]

    def swap_halves(x):
        # [x1, x2] -> [x2, x1]; XLU lane roll when lane-aligned (free slot),
        # slice+concat fallback otherwise (correct, just slower).
        if D % 128 == 0:
            return pltpu.roll(x, shift=half, axis=x.ndim - 1)
        return jnp.concatenate([x[..., half:], x[..., :half]], axis=-1)

    q = q_ref[...].astype(jnp.float32)
    k = k_ref[...].astype(jnp.float32)
    qo_ref[...] = (q * cos_b + swap_halves(q) * sin_b).astype(qo_ref.dtype)
    ko_ref[...] = (k * cos_b + swap_halves(k) * sin_b).astype(ko_ref.dtype)


def apply_rotary_pos_emb(q, k, cos, sin, *, donate_qk=False):
    B, S, H, D = q.shape
    assert k.shape == q.shape
    assert cos.shape == (S, D) and sin.shape == (S, D)
    half = D // 2

    # Fold rotate_half's sign into sin once, outside the kernel (tiny [S, D] op):
    #   x*cos + rotate_half(x)*sin == x*cos + swap_halves(x)*sin_signed
    sin_signed = jnp.concatenate(
        [-sin[:, :half], sin[:, half:]], axis=-1).astype(jnp.float32)
    cos = cos.astype(jnp.float32)

    cap = _vmem_capacity_bytes()
    budget = (cap * 3) // 8              # ~24 MiB on v7x, ~48 MiB on v5e/v6e
    vmem_limit = (cap * 5) // 8          # ~40 MiB on v7x, ~80 MiB on v5e/v6e

    ts = _choose_seq_tile(S, H, D, q.dtype.itemsize, budget)
    # v7x has 2 TensorCores: keep >=2 grid steps when possible so megacore
    # sharding over the parallel axes is not load-imbalanced.
    if B == 1 and ts >= S and S > 8:
        ts = max(8, (pl.cdiv(S, 2) // 8) * 8)

    # Batch innermost: cos/sin block index is unchanged across consecutive grid
    # steps, so each table tile is DMA'd once per seq tile instead of once per
    # (batch, seq_tile).
    grid = (pl.cdiv(S, ts), B)
    qk_spec = pl.BlockSpec((1, ts, H, D), lambda s, b: (b, s, 0, 0))
    cs_spec = pl.BlockSpec((ts, D), lambda s, b: (s, 0))

    q_out, k_out = pl.pallas_call(
        _apply_rope_kernel,
        out_shape=(
            jax.ShapeDtypeStruct(q.shape, q.dtype),
            jax.ShapeDtypeStruct(k.shape, k.dtype),
        ),
        grid=grid,
        in_specs=[cs_spec, cs_spec, qk_spec, qk_spec],
        out_specs=(qk_spec, qk_spec),
        input_output_aliases=({2: 0, 3: 1} if donate_qk else {}),
        compiler_params=pltpu.CompilerParams(
            dimension_semantics=("parallel", "parallel"),
            vmem_limit_bytes=int(vmem_limit),
        ),
    )(cos, sin_signed, q, k)
    return q_out, k_out


# ---------------------------------------------------------------------------
# Module-like wrapper (deterministic "parameters": inv_freq buffer)
# ---------------------------------------------------------------------------
class RotaryPositionEmbeddingPallas:
    def __init__(self, dim: int, max_position_embeddings: int = 2048, base: int = 10000):
        self.dim = dim
        self.max_seq_len = max_position_embeddings
        # inv_freq = 1 / base ** (arange(0, dim, 2) / dim)
        self.inv_freq = 1.0 / (
            base ** (jnp.arange(0, dim, 2, dtype=jnp.float32) / dim)
        )
        # host-side cache, mirroring the PyTorch module's cached_cos/sin
        self._cached_seq_len = None
        self._cached = None

    def __call__(self, x, seq_len: int):
        if seq_len > self.max_seq_len:
            raise ValueError(
                f"Sequence length {seq_len} exceeds maximum length {self.max_seq_len}"
            )
        if self._cached_seq_len != seq_len:
            self._cached_seq_len = seq_len
            self._cached = rope_tables(self.inv_freq, seq_len, self.dim)
        return self._cached

    @staticmethod
    def apply_rotary_pos_emb(q, k, cos, sin):
        return apply_rotary_pos_emb(q, k, cos, sin)


# ---------------------------------------------------------------------------
# Pure-JAX reference (for a correctness check)
# ---------------------------------------------------------------------------
def _ref_rotate_half(x):
    d = x.shape[-1]
    x1, x2 = x[..., : d // 2], x[..., d // 2:]
    return jnp.concatenate([-x2, x1], axis=-1)


def _ref_forward(inv_freq, seq_len):
    t = jnp.arange(seq_len, dtype=jnp.float32)
    freqs = jnp.einsum("i,j->ij", t, inv_freq)
    emb = jnp.concatenate([freqs, freqs], axis=-1)
    return jnp.cos(emb), jnp.sin(emb)


def _ref_apply(q, k, cos, sin):
    cos = cos[None, :, None, :]
    sin = sin[None, :, None, :]
    return q * cos + _ref_rotate_half(q) * sin, k * cos + _ref_rotate_half(k) * sin


if __name__ == "__main__":
    # H=8 keeps the (H, D) trailing block sublane-dense for f32; D=128 keeps it
    # lane-dense and exercises the pltpu.roll path.
    batch, seq, heads, dim = 2, 16, 8, 128

    key = jax.random.PRNGKey(0)
    kq, kk = jax.random.split(key)
    q = jax.random.normal(kq, (batch, seq, heads, dim), dtype=jnp.float32)
    k = jax.random.normal(kk, (batch, seq, heads, dim), dtype=jnp.float32)

    rope = RotaryPositionEmbeddingPallas(dim=dim, max_position_embeddings=2048)

    # forward: build cos/sin tables in a Pallas kernel
    cos, sin = rope(q, seq)
    cos, sin = jax.block_until_ready((cos, sin))

    # apply rotary embedding to q/k in a Pallas kernel
    q_emb, k_emb = rope.apply_rotary_pos_emb(q, k, cos, sin)
    q_emb, k_emb = jax.block_until_ready((q_emb, k_emb))

    # correctness check vs pure-JAX reference
    cos_ref, sin_ref = _ref_forward(rope.inv_freq, seq)
    q_ref, k_ref = _ref_apply(q, k, cos_ref, sin_ref)
    assert jnp.allclose(cos, cos_ref, atol=1e-5)
    assert jnp.allclose(sin, sin_ref, atol=1e-5)
    assert jnp.allclose(q_emb, q_ref, atol=1e-4)
    assert jnp.allclose(k_emb, k_ref, atol=1e-4)

    print("KERNEL_OK")
</pallas_src>

<mosaic_0001>
module attributes {stable_mosaic.version = 11 : i64} {
  func.func @_rope_tables_kernel(%arg0: i32, %arg1: memref<1x64xf32, #tpu.memory_space<vmem>>, %arg2: memref<16x128xf32, #tpu.memory_space<vmem>>, %arg3: memref<16x128xf32, #tpu.memory_space<vmem>>) attributes {dimension_semantics = [#tpu.dimension_semantics<parallel>], iteration_bounds = array<i64: 1>, scalar_prefetch = 0 : i64, scratch_operands = 0 : i64, tpu.core_type = #tpu.core_type<tc>, window_params = [{pipeline_mode = #tpu.pipeline_mode<synchronous>, transform_indices = @transform_0, window_bounds = array<i64: 1, 64>}, {transform_indices = @transform_1, window_bounds = array<i64: 16, 128>}, {transform_indices = @transform_2, window_bounds = array<i64: 16, 128>}]} {
    %c16_i32 = arith.constant 16 : i32
    %0 = arith.muli %arg0, %c16_i32 : i32
    %1 = tpu.iota {dimensions = array<i32: 0>} : vector<16x64xi32>
    %2 = vector.broadcast %0 : i32 to vector<16x64xi32>
    %3 = arith.addi %1, %2 : vector<16x64xi32>
    %4 = arith.sitofp %3 : vector<16x64xi32> to vector<16x64xf32>
    %c0 = arith.constant 0 : index
    %c0_0 = arith.constant 0 : index
    %5 = vector.load %arg1[%c0, %c0_0] : memref<1x64xf32, #tpu.memory_space<vmem>>, vector<1x64xf32>
    %6 = vector.broadcast %5 : vector<1x64xf32> to vector<16x64xf32>
    %7 = arith.mulf %4, %6 : vector<16x64xf32>
    %8 = math.cos %7 : vector<16x64xf32>
    %9 = math.sin %7 : vector<16x64xf32>
    %10 = tpu.concatenate %8, %8 in 1 : vector<16x64xf32>, vector<16x64xf32> -> vector<16x128xf32>
    %c0_1 = arith.constant 0 : index
    %c0_2 = arith.constant 0 : index
    %11 = vector.load %arg2[%c0_1, %c0_2] : memref<16x128xf32, #tpu.memory_space<vmem>>, vector<16x128xf32>
    tpu.vector_store %arg2[%c0_1, %c0_2], %10 {strides = array<i32>} : memref<16x128xf32, #tpu.memory_space<vmem>>, vector<16x128xf32>,
    %12 = tpu.concatenate %9, %9 in 1 : vector<16x64xf32>, vector<16x64xf32> -> vector<16x128xf32>
    %c0_3 = arith.constant 0 : index
    %c0_4 = arith.constant 0 : index
    %13 = vector.load %arg3[%c0_3, %c0_4] : memref<16x128xf32, #tpu.memory_space<vmem>>, vector<16x128xf32>
    tpu.vector_store %arg3[%c0_3, %c0_4], %12 {strides = array<i32>} : memref<16x128xf32, #tpu.memory_space<vmem>>, vector<16x128xf32>,
    return
  }
  func.func @transform_0(%arg0: i32) -> (i32, i32) {
    %c0_i32 = arith.constant 0 : i32
    %c0_i32_0 = arith.constant 0 : i32
    %c0_i32_1 = arith.constant 0 : i32
    return %c0_i32, %c0_i32_0 : i32, i32
  }
  func.func @transform_1(%arg0: i32) -> (i32, i32) {
    %c0_i32 = arith.constant 0 : i32
    %c0_i32_0 = arith.constant 0 : i32
    return %arg0, %c0_i32 : i32, i32
  }
  func.func @transform_2(%arg0: i32) -> (i32, i32) {
    %c0_i32 = arith.constant 0 : i32
    %c0_i32_0 = arith.constant 0 : i32
    return %arg0, %c0_i32 : i32, i32
  }
}

</mosaic_0001>

<bundles_post_ra>
// kernel: tpu_custom_call.1
= control target key start
LH: loop header
LB: loop body
LE: loop exit
PB: predicated region body
PF: predicated region fallthrough
CT: control target
= control target key end

     0   :  { %8 = vsyncpa [#allocation3], 0  ;;  %s771_s0 = inlined_call_operand.hbm [shape: f32[1,64], index: 0, kind: input, shape index: {}]   ;;  %s772_s1 = inlined_call_operand.hbm [shape: f32[16,128], index: 1, kind: output, shape index: {0}]   ;;  %s773_s2 = inlined_call_operand.hbm [shape: f32[16,128], index: 2, kind: output, shape index: {1}]  }
   0x1   :  { %9 = vsyncpa [#allocation4], 0 }
   0x2   :  { %10 = vsyncpa [#allocation7], 0  ;;  %s631_s9 = smov [#allocation2]   ;;  %s559_s13 = scalar_lea.hbm %s771_s0, 16 }
   0x3   :  { %s17_s10 = sshll.u32 %s631_s9, 4  ;;  %p560_p0 = scmp.ne.s32.totalorder %s771_s0, %s559_s13  ;;  %s18_s10 = int_to_ptr.vmem [resolvable:$true] %s17_s10 }
   0x4   :  { %p563_p1 = scmp.lt.u32.totalorder %s559_s13, %s771_s0 }
   0x6   :  { %p565_p2 = pnand %p563_p1, %p560_p0 }
   0x8   :  { %568 = shalt.err (!%p565_p2)
}
   0x9   :  { %s569_s18 = scalar_lea.vmem %s18_s10, 16  ;;  %s573_s19 = scalar_lea.vmem %s18_s10, 32 }
   0xa   :  { %p570_p3 = scmp.ne.s32.totalorder %s18_s10, %s569_s18  ;;  %p574_p4 = scmp.lt.s32.totalorder %s18_s10, %s18_s10 }
   0xb   :  { %p575_p5 = scmp.lt.s32.totalorder %s573_s19, %s569_s18 }
   0xd   :  { %p576_p6 = por %p575_p5, %p574_p4 }
   0xf   :  { %p577_p7 = pnand %p576_p6, %p570_p3 }
  0x11   :  { %580 = shalt.err (!%p577_p7)
}
  0x12   :  { %20 = dma.hbm_to_vmem [thread:$0]  %s771_s0, 16, %s18_s10, [#allocation3]  }
  0x13   :  { %625 = dma.done.wait [#allocation3], 16  }
  0x14   :  { %626 = vsyncadd [#allocation3], 4294967280  ;;  %v25_v0 = vlaneseq  ;;  %v514_v5 = vld [vmem:[#allocation2] ss:$0 sm:$0xff]  ;;  %v632_v30 = vmov 683565275  }
  0x15   :  { %v633_v32 = vmov 2475754826   ;;  %v634_v34 = vmov 2131351028   ;;  %v635_v36 = vmov 2102212464  }
  0x16   :  { %v26_v1 = vshrl.u32 %v25_v0, 7  ;;  %v636_v38 = vmov 920167782   ;;  %v637_v46 = vmov 1326507024   ;;  %s638_s0 = smov 64  }
  0x17   :  { %s639_s22 = smov [#allocation5]   ;;  %s640_s24 = smov [#allocation6]  }
  0x18   :  { %v31_v2 = vcvt.s32.f32 %v26_v1  ;;  %v27_v3 = vadd.s32 8, %v26_v1  ;;  %s486_s23 = sshll.u32 %s639_s22, 4  ;;  %s498_s25 = sshll.u32 %s640_s24, 4  ;;  %s487_s23 = int_to_ptr.vmem [resolvable:$true] %s486_s23  ;;  %s740_s25 = int_to_ptr.vmem [resolvable:$true] %s498_s25 }
  0x19   :  { %s581_s26 = scalar_lea.vmem %s487_s23, 256  ;;  %p586_p9 = scmp.lt.s32.totalorder %s487_s23, %s487_s23 }
  0x1a   :  { %v32_v4 = vcvt.s32.f32 %v27_v3  ;;  %v670_v6 = vmul.f32 %v514_v5, %v31_v2  ;;  %p582_p8 = scmp.ne.s32.totalorder %s487_s23, %s581_s26  ;;  %p587_p10 = scmp.lt.s32.totalorder %s581_s26, %s581_s26 }
  0x1c   :  { %v672_v7 = vmul.f32 %v514_v5, %v32_v4  ;;  %v42_v8 = vand.u32 2147483647, %v670_v6  ;;  %v45_v9 = vand.u32 2139095040, %v670_v6  ;;  %vm44_vm14 = vcmp.lt.s32.totalorder %v670_v6, 0  ;;  %p588_p11 = por %p587_p10, %p586_p9 }
  0x1e   :  { %v145_v10 = vand.u32 2147483647, %v672_v7  ;;  %v148_v11 = vand.u32 2139095040, %v672_v7  ;;  %v46_v12 = vshrl.u32 %v45_v9, 23  ;;  %v49_v13 = vand.u32 8388607, %v42_v8  ;;  %p589_p12 = pnand %p588_p11, %p582_p8 }
  0x1f   :  { %vm43_vm15 = vcmp.le.f32.partialorder %v42_v8, 0.7853982 }
  0x20   :  { %v149_v14 = vshrl.u32 %v148_v11, 23  ;;  %v152_v15 = vand.u32 8388607, %v145_v10  ;;  %v515_v16 = vadd.s32 4294967169, %v46_v12  ;;  %v50_v19 = vor.u32 8388608, %v49_v13 }
  0x22   :  { %v519_v17 = vadd.s32 4294967169, %v149_v14  ;;  %v52_v18 = vadd.s32 1, %v515_v16  ;;  %v153_v20 = vor.u32 8388608, %v152_v15  ;;  %v682_v26 = vshll.u32 %v50_v19, 8 }
  0x24   :  { %v155_v21 = vadd.s32 1, %v519_v17  ;;  %vm53_vm0 = vcmp.gt.s32.totalorder %v52_v18, 0  ;;  %v684_v28 = vshll.u32 %v153_v20, 8 }
  0x25   :  { %v54_v22 = vsel %vm53_vm0, %v52_v18, 0  ;;  %vm147_vm0 = vcmp.lt.s32.totalorder %v672_v7, 0 }
  0x26   :  { %vm156_vm1 = vcmp.gt.s32.totalorder %v155_v21, 0  ;;  %v55_v23 = vshrl.u32 %v54_v22, 5  ;;  %v56_v24 = vand.u32 31, %v54_v22 }
  0x27   :  { %v157_v25 = vsel %vm156_vm1, %v155_v21, 0  ;;  %vm146_vm1 = vcmp.le.f32.partialorder %v145_v10, 0.7853982 }
  0x28   :  { %v159_v27 = vand.u32 31, %v157_v25  ;;  %v57_v29 = vsub.s32 32, %v56_v24  ;;  %v59_v31 = vshll.u32 %v632_v30, %v56_v24  ;;  %v62_v33 = vshll.u32 %v633_v32, %v56_v24 }
  0x29   :  { %v65_v35 = vshll.u32 %v634_v34, %v56_v24  ;;  %v68_v37 = vshll.u32 %v635_v36, %v56_v24  ;;  %v71_v39 = vshll.u32 %v636_v38, %v56_v24  ;;  %vm74_vm2 = vcmp.lt.s32.totalorder %v55_v23, 1 }
  0x2a   :  { %v686_v40 = vshrl.u32 %v157_v25, 5  ;;  %v58_v41 = vshrl.u32 %v632_v30, %v57_v29  ;;  %v60_v42 = vshrl.u32 %v633_v32, %v57_v29  ;;  %v63_v43 = vshrl.u32 %v634_v34, %v57_v29 }
  0x2b   :  { %v66_v44 = vshrl.u32 %v635_v36, %v57_v29  ;;  %v69_v45 = vshrl.u32 %v636_v38, %v57_v29  ;;  %v72_v47 = vshrl.u32 %v637_v46, %v57_v29  ;;  %vm75_vm3 = vcmp.lt.s32.totalorder %v55_v23, 2 }
  0x2c   :  { %vm77_vm4 = vcmp.lt.s32.totalorder %v55_v23, 4  ;;  %v61_v48 = vor.u32 %v60_v42, %v59_v31  ;;  %v64_v49 = vor.u32 %v63_v43, %v62_v33  ;;  %v160_v51 = vsub.s32 32, %v159_v27 }
  0x2d   :  { %v67_v50 = vor.u32 %v66_v44, %v65_v35  ;;  %v70_v52 = vor.u32 %v69_v45, %v68_v37  ;;  %v73_v53 = vor.u32 %v72_v47, %v71_v39  ;;  %vm76_vm5 = vcmp.lt.s32.totalorder %v55_v23, 3 }
  0x2e   :  { %v162_v54 = vshll.u32 %v632_v30, %v159_v27  ;;  %v78_v55 = vsel %vm74_vm2, %v58_v41, %v61_v48  ;;  %v82_v57 = vsel %vm74_vm2, %v61_v48, %v64_v49  ;;  %v165_v62 = vshll.u32 %v633_v32, %v159_v27 }
  0x2f   :  { %v79_v56 = vsel %vm77_vm4, %v67_v50, 2102212464  ;;  %v86_v58 = vsel %vm74_vm2, %v64_v49, %v67_v50  ;;  %v83_v60 = vsel %vm77_vm4, %v70_v52, 920167782  ;;  %v87_v61 = vsel %vm77_vm4, %v73_v53, 1326507024 }
  0x30   :  { %v80_v59 = vsel %vm76_vm5, %v64_v49, %v79_v56  ;;  %v84_v63 = vsel %vm76_vm5, %v67_v50, %v83_v60  ;;  %v88_v0 = vsel %vm76_vm5, %v70_v52, %v87_v61  ;;  %v161_v1 = vshrl.u32 %v632_v30, %v160_v51 }
  0x31   :  { %v163_v2 = vshrl.u32 %v633_v32, %v160_v51  ;;  %v81_v3 = vsel %vm75_vm3, %v78_v55, %v80_v59  ;;  %v85_v4 = vsel %vm75_vm3, %v82_v57, %v84_v63  ;;  %v89_v5 = vsel %vm75_vm3, %v86_v58, %v88_v0 }
  0x32   :  { %v166_v9 = vshrl.u32 %v634_v34, %v160_v51  ;;  %v695_v11 = vmul.u32.u64.low %v682_v26, %v89_v5  ;;  %v696_v12 = vmul.u32.u64.high %v682_v26, %v89_v5, %v695_v11  ;;  %v168_v17 = vshll.u32 %v634_v34, %v159_v27 }
  0x33   :  { %v699_v13 = vmul.u32.u64.low %v682_v26, %v85_v4  ;;  %v700_v14 = vmul.u32.u64.high %v682_v26, %v85_v4, %v699_v13  ;;  %v164_v15 = vor.u32 %v163_v2, %v162_v54  ;;  %v169_v18 = vshrl.u32 %v635_v36, %v160_v51 }
  0x34   :  { %v167_v16 = vor.u32 %v166_v9, %v165_v62  ;;  %v171_v19 = vshll.u32 %v635_v36, %v159_v27  ;;  %v172_v20 = vshrl.u32 %v636_v38, %v160_v51  ;;  %v174_v21 = vshll.u32 %v636_v38, %v159_v27 }
  0x35   :  { %v175_v22 = vshrl.u32 %v637_v46, %v160_v51  ;;  %v97_v23 = vmul.u32 %v682_v26, %v81_v3  ;;  %v170_v24 = vor.u32 %v169_v18, %v168_v17  ;;  %vm177_vm6 = vcmp.lt.s32.totalorder %v686_v40, 1 }
  0x36   :  { %vm178_vm7 = vcmp.lt.s32.totalorder %v686_v40, 2  ;;  %vm99_vm8 = vc.u32 %v696_v12, %v699_v13  ;;  %v100_v25 = vadd.s32 1, %v700_v14  ;;  %v173_v29 = vor.u32 %v172_v20, %v171_v19 }
  0x37   :  { %vm179_vm9 = vcmp.lt.s32.totalorder %v686_v40, 3  ;;  %v176_v30 = vor.u32 %v175_v22, %v174_v21  ;;  %vm180_vm10 = vcmp.lt.s32.totalorder %v686_v40, 4  ;;  %v181_v31 = vsel %vm177_vm6, %v161_v1, %v164_v15 }
  0x38   :  { %v185_v27 = vsel %vm177_vm6, %v164_v15, %v167_v16  ;;  %v101_v32 = vsel %vm99_vm8, %v100_v25, %v700_v14  ;;  %v182_v26 = vsel %vm180_vm10, %v170_v24, 2102212464  ;;  %v186_v33 = vsel %vm180_vm10, %v173_v29, 920167782 }
  0x39   :  { %v189_v34 = vsel %vm177_vm6, %v167_v16, %v170_v24  ;;  %v102_v35 = vadd.s32 %v101_v32, %v97_v23  ;;  %v183_v36 = vsel %vm179_vm9, %v167_v16, %v182_v26  ;;  %v187_v37 = vsel %vm179_vm9, %v170_v24, %v186_v33 }
  0x3a   :  { %v190_v38 = vsel %vm180_vm10, %v176_v30, 1326507024  ;;  %v184_v39 = vsel %vm178_vm7, %v181_v31, %v183_v36  ;;  %v188_v41 = vsel %vm178_vm7, %v185_v27, %v187_v37  ;;  %v98_v63 = vadd.s32 %v699_v13, %v696_v12 }
  0x3b   :  { %v191_v42 = vsel %vm179_vm9, %v173_v29, %v190_v38  ;;  %v103_v43 = vadd.s32 536870912, %v102_v35  ;;  %v717_v45 = vmul.u32.u64.low %v684_v28, %v188_v41  ;;  %v718_v46 = vmul.u32.u64.high %v684_v28, %v188_v41, %v717_v45 }
  0x3c   :  { %v192_v44 = vsel %vm178_vm7, %v189_v34, %v191_v42  ;;  %v200_v50 = vmul.u32 %v684_v28, %v184_v39  ;;  %vm134_vm8 = vweird.f32 %v670_v6 }
  0x3d   :  { %v721_v47 = vmul.u32.u64.low %v684_v28, %v192_v44  ;;  %v722_v48 = vmul.u32.u64.high %v684_v28, %v192_v44, %v721_v47  ;;  %v104_v49 = vshrl.u32 %v103_v43, 30  ;;  %v203_v52 = vadd.s32 1, %v718_v46 }
  0x3f   :  { %v105_v51 = vshll.u32 %v104_v49, 30  ;;  %vm202_vm11 = vc.u32 %v722_v48, %v717_v45  ;;  %v201_v19 = vadd.s32 %v717_v45, %v722_v48  ;;  %v128_v12 = vsub.s32 4, %v104_v49 }
  0x40   :  { %v204_v40 = vsel %vm202_vm11, %v203_v52, %v718_v46 }
  0x41   :  { %v106_v53 = vsub.s32 %v102_v35, %v105_v51  ;;  %v205_v54 = vadd.s32 %v204_v40, %v200_v50  ;;  %v129_v31 = vsel %vm44_vm14, %v128_v12, %v104_v49 }
  0x42   :  { %v131_v34 = vsel %vm43_vm15, 0, %v129_v31 }
  0x43   :  { %v108_v55 = vsub.s32 0, %v106_v53  ;;  %v206_v56 = vadd.s32 536870912, %v205_v54  ;;  %v341_v39 = vadd.s32 3, %v131_v34  ;;  %v135_v44 = vand.u32 3, %v131_v34 }
  0x45   :  { %v516_v57 = vmin.u32 %v108_v55, %v106_v53  ;;  %v207_v58 = vshrl.u32 %v206_v56, 30  ;;  %v342_v43 = vand.u32 3, %v341_v39  ;;  %vm140_vm3 = vcmp.eq.s32.totalorder %v135_v44, 2 }
  0x46   :  { %vm137_vm5 = vcmp.eq.s32.totalorder %v135_v44, 0  ;;  %vm136_vm7 = vcmp.lt.s32.totalorder %v135_v44, 2 }
  0x47   :  { %v110_v59 = vclz %v516_v57  ;;  %v208_v60 = vshll.u32 %v207_v58, 30  ;;  %v231_v38 = vsub.s32 4, %v207_v58  ;;  %vm347_vm2 = vcmp.eq.s32.totalorder %v342_v43, 2 }
  0x48   :  { %vm344_vm4 = vcmp.eq.s32.totalorder %v342_v43, 0  ;;  %vm343_vm6 = vcmp.lt.s32.totalorder %v342_v43, 2 }
  0x49   :  { %v517_v61 = vadd.s32 4294967294, %v110_v59  ;;  %v209_v62 = vsub.s32 %v205_v54, %v208_v60  ;;  %v232_v42 = vsel %vm147_vm0, %v231_v38, %v207_v58 }
  0x4a   :  { %v234_v47 = vsel %vm146_vm1, 0, %v232_v42 }
  0x4b   :  { %vm518_vm12 = vcmp.lt.s32.totalorder %v517_v61, 0  ;;  %v211_v0 = vsub.s32 0, %v209_v62  ;;  %v445_v51 = vadd.s32 3, %v234_v47  ;;  %v238_v58 = vand.u32 3, %v234_v47 }
  0x4c   :  { %v113_v28 = vsel %vm518_vm12, 0, %v517_v61 }
  0x4d   :  { %v114_v1 = vsub.s32 32, %v113_v28  ;;  %v115_v2 = vshll.u32 %v106_v53, %v113_v28  ;;  %v118_v3 = vsub.s32 4294967266, %v113_v28  ;;  %v520_v4 = vmin.u32 %v211_v0, %v209_v62 }
  0x4e   :  { %v446_v57 = vand.u32 3, %v445_v51  ;;  %vm243_vm10 = vcmp.eq.s32.totalorder %v238_v58, 2  ;;  %vm240_vm12 = vcmp.eq.s32.totalorder %v238_v58, 0 }
  0x4f   :  { %v116_v5 = vshrl.u32 %v98_v63, %v114_v1  ;;  %v119_v9 = vadd.s32 127, %v118_v3  ;;  %v213_v11 = vclz %v520_v4 }
  0x50   :  { %vm451_vm9 = vcmp.eq.s32.totalorder %v446_v57, 2  ;;  %vm448_vm11 = vcmp.eq.s32.totalorder %v446_v57, 0 }
  0x51   :  { %v117_v14 = vor.u32 %v116_v5, %v115_v2  ;;  %v120_v15 = vshll.u32 %v119_v9, 23  ;;  %v521_v16 = vadd.s32 4294967294, %v213_v11 }
  0x53   :  { %v121_v17 = vor.u32 4788187, %v120_v15  ;;  %v124_v18 = vcvt.s32.f32 %v117_v14  ;;  %vm522_vm13 = vcmp.lt.s32.totalorder %v521_v16, 0 }
  0x54   :  { %v216_v13 = vsel %vm522_vm13, 0, %v521_v16  ;;  %vm447_vm13 = vcmp.lt.s32.totalorder %v446_v57, 2 }
  0x55   :  { %v122_v20 = vand.u32 2147483647, %v121_v17  ;;  %v217_v21 = vsub.s32 32, %v216_v13  ;;  %v218_v22 = vshll.u32 %v209_v62, %v216_v13  ;;  %v221_v23 = vsub.s32 4294967266, %v216_v13 }
  0x57   :  { %v125_v24 = vmul.f32 %v124_v18, %v122_v20  ;;  %v219_v25 = vshrl.u32 %v201_v19, %v217_v21  ;;  %v222_v29 = vadd.s32 127, %v221_v23 }
  0x59   :  { %v126_v30 = vxor.u32 2147483648, %v125_v24  ;;  %v220_v27 = vor.u32 %v219_v25, %v218_v22  ;;  %v223_v32 = vshll.u32 %v222_v29, 23 }
  0x5b   :  { %v127_v26 = vsel %vm44_vm14, %v126_v30, %v125_v24  ;;  %v224_v35 = vor.u32 4788187, %v223_v32  ;;  %v227_v36 = vcvt.s32.f32 %v220_v27  ;;  %vm239_vm14 = vcmp.lt.s32.totalorder %v238_v58, 2 }
  0x5c   :  { %v130_v33 = vsel %vm43_vm15, %v670_v6, %v127_v26  ;;  %vm237_vm15 = vweird.f32 %v672_v7 }
  0x5d   :  { %551 = vcosq.f32 %v130_v33  ;;  %v225_v37 = vand.u32 2147483647, %v224_v35 }
  0x5e   :  { %553 = vsinq.f32 %v130_v33 }
  0x5f   :  { %v228_v41 = vmul.f32 %v227_v36, %v225_v37 }
  0x61   :  { %v229_v8 = vxor.u32 2147483648, %v228_v41 }
  0x63   :  { %v230_v45 = vsel %vm147_vm0, %v229_v8, %v228_v41  ;;  %vm464_vm0 = vcmask 523264  }
  0x64   :  { %v233_v46 = vsel %vm146_vm1, %v672_v7, %v230_v45 }
  0x65   :  { %555 = vcosq.f32 %v233_v46 }
  0x66   :  { %557 = vsinq.f32 %v233_v46 }
  0x67   :  { %v552_v48 = vpop.eup %551 }
  0x68   :  { %v554_v49 = vpop.eup %553  ;;  %v141_v50 = vxor.u32 2147483648, %v552_v48 }
  0x69   :  { %v138_v52 = vxor.u32 2147483648, %v554_v49 }
  0x6a   :  { %v349_v10 = vsel %vm347_vm2, %v141_v50, %v554_v49  ;;  %v142_v53 = vsel %vm140_vm3, %v141_v50, %v554_v49 }
  0x6b   :  { %v346_v40 = vsel %vm344_vm4, %v552_v48, %v138_v52  ;;  %v139_v54 = vsel %vm137_vm5, %v552_v48, %v138_v52 }
  0x6c   :  { %v350_v55 = vsel %vm343_vm6, %v346_v40, %v349_v10  ;;  %v143_v56 = vsel %vm136_vm7, %v139_v54, %v142_v53 }
  0x6d   :  { %v351_v59 = vsel %vm134_vm8, nan, %v350_v55  ;;  %v144_v60 = vsel %vm134_vm8, nan, %v143_v56 }
  0x6e   :  { %471 = vrot.lane.b32.xlu1 %v351_v59, %s638_s0  ;;  %458 = vrot.lane.b32.xlu0 %v144_v60, %s638_s0 }
  0x6f   :  { %v556_v61 = vpop.eup %555 }
  0x70   :  { %v558_v62 = vpop.eup %557  ;;  %v244_v63 = vxor.u32 2147483648, %v556_v61 }
  0x71   :  { %v241_v6 = vxor.u32 2147483648, %v558_v62 }
  0x72   :  { %v453_v28 = vsel %vm451_vm9, %v244_v63, %v558_v62  ;;  %v245_v0 = vsel %vm243_vm10, %v244_v63, %v558_v62 }
  0x73   :  { %v450_v1 = vsel %vm448_vm11, %v556_v61, %v241_v6  ;;  %v242_v2 = vsel %vm240_vm12, %v556_v61, %v241_v6 }
  0x74   :  { %v454_v3 = vsel %vm447_vm13, %v450_v1, %v453_v28  ;;  %v246_v4 = vsel %vm239_vm14, %v242_v2, %v245_v0 }
  0x75   :  { %v455_v5 = vsel %vm237_vm15, nan, %v454_v3  ;;  %v247_v9 = vsel %vm237_vm15, nan, %v246_v4 }
  0x76   :  { %473 = vrot.lane.b32.xlu1 %v455_v5, %s638_s0  ;;  %460 = vrot.lane.b32.xlu0 %v247_v9, %s638_s0 }
  0xe0   :  { %v472_v11 = vpop.permute.xlu1 %471  ;;  %v459_v14 = vpop.permute.xlu0 %458 }
  0xe1   :  { %v477_v15 = vsel %vm464_vm0, %v351_v59, %v472_v11  ;;  %v465_v16 = vsel %vm464_vm0, %v144_v60, %v459_v14 }
  0xe2   :  { %479 = vst [vmem:[#allocation6] sm:$0xff] %v477_v15  ;;  %467 = vst [vmem:[#allocation5] sm:$0xff] %v465_v16 }
  0xe8   :  { %v474_v7 = vpop.permute.xlu1 %473  ;;  %v461_v17 = vpop.permute.xlu0 %460 }
  0xe9   :  { %v478_v18 = vsel %vm464_vm0, %v455_v5, %v474_v7  ;;  %v466_v19 = vsel %vm464_vm0, %v247_v9, %v461_v17 }
  0xea   :  { %480 = vst [vmem:[#allocation6 + $0x8] sm:$0xff] %v478_v18  ;;  %468 = vst [vmem:[#allocation5 + $0x8] sm:$0xff] %v466_v19 }
  0xeb   :  { %592 = shalt.err (!%p589_p12)
}
  0xec   :  { %s593_s29 = scalar_lea.hbm %s772_s1, 256 }
  0xed   :  { %p594_p13 = scmp.ne.s32.totalorder %s772_s1, %s593_s29  ;;  %p597_p0 = scmp.lt.u32.totalorder %s593_s29, %s772_s1 }
  0xef   :  { %p599_p1 = pnand %p597_p0, %p594_p13 }
  0xf1   :  { %602 = shalt.err (!%p599_p1)
}
  0xf2   :  { %s641_s6 = smov 128   ;;  %s642_s7 = smov 8  }
  0xf3   :  { %492 = dma.vmem_to_hbm [thread:$0]  %s487_s23, 256, %s772_s1, [#allocation4], %s641_s6, %s641_s6, %s642_s7  }
  0xf4   :  { %s603_s10 = scalar_lea.vmem %s740_s25, 256  ;;  %p608_p3 = scmp.lt.s32.totalorder %s740_s25, %s740_s25 }
  0xf5   :  { %p604_p2 = scmp.ne.s32.totalorder %s740_s25, %s603_s10  ;;  %p609_p4 = scmp.lt.s32.totalorder %s603_s10, %s603_s10 }
  0xf7   :  { %p610_p5 = por %p609_p4, %p608_p3 }
  0xf9   :  { %p611_p6 = pnand %p610_p5, %p604_p2 }
  0xfb   :  { %614 = shalt.err (!%p611_p6)
}
  0xfc   :  { %s615_s13 = scalar_lea.hbm %s773_s2, 256 }
  0xfd   :  { %p616_p7 = scmp.ne.s32.totalorder %s773_s2, %s615_s13  ;;  %p619_p8 = scmp.lt.u32.totalorder %s615_s13, %s773_s2 }
  0xff   :  { %p621_p9 = pnand %p619_p8, %p616_p7 }
 0x101   :  { %624 = shalt.err (!%p621_p9)
}
 0x102   :  { %504 = dma.vmem_to_hbm [thread:$0]  %s740_s25, 256, %s773_s2, [#allocation7], %s641_s6, %s641_s6, %s642_s7  }
 0x103   :  { %627 = dma.done.wait [#allocation4], 256  }
 0x104   :  { %628 = vsyncadd [#allocation4], 4294967040 }
 0x105   :  { %629 = dma.done.wait [#allocation7], 256  }
 0x106   :  { %630 = vsyncadd [#allocation7], 4294967040 }
 0x107   :  { %511 = vsyncpa [#allocation3], 1 }
 0x108   :  { %512 = vsyncpa [#allocation4], 1 }
 0x109   :  { %513 = vsyncpa [#allocation7], 1 }

</bundles_post_ra>
